<compile_context>
chip_gen: v5e
topology: v5e:2x2
jax: 0.10.0
libtpu: 0.0.40
codegen_flags: <defaults>
</compile_context>

<pallas_src>
import numpy as np

import jax
import jax.numpy as jnp
from jax.experimental import pallas as pl
from jax.experimental.pallas import tpu as pltpu


def feature_agg_kernel(idx_ref, x_ref, adj_ref, o_ref):
    # idx_ref : (gps, G*M, K) int32  -- neighbor ids, pre-offset by (bt % G) * N
    # x_ref   : (gps, G*N, D)        -- node features, G (b,t) slices stacked
    # adj_ref : (G*M, K*K)   float32 -- adj_big[g*M+m, i*K+j] == adj[m, i, j]
    # o_ref   : (gps, D, G*N) float32-- transposed, lane-dense output slab
    n_groups, GM, K = idx_ref.shape
    _, L, D = x_ref.shape

    # ---- group-invariant data, hoisted out of the group loop ----
    adj = adj_ref[...]                                               # (GM, K*K)
    a_col = [adj[:, c:c + 1] for c in range(K * K)]                  # (GM, 1) each
    iota_l = jax.lax.broadcasted_iota(jnp.int32, (GM, L), 1)         # node-slot ids on lanes
    dn = (((0,), (0,)), ((), ()))                                    # contract dim 0 of both

    def body(grp, carry):
        idx2 = idx_ref[grp]                                          # (GM, K)
        x_g = x_ref[grp].astype(jnp.float32)                         # (L, D)

        # One-hot matrices, one per neighbor slot j (~128 lanes wide).
        cmp = [(idx2[:, j:j + 1] == iota_l).astype(jnp.float32) for j in range(K)]

        # counts[l] = 1e-14 + #{(m, i): g*N + idx[g,m,i] == l}
        hits = cmp[0]
        for j in range(1, K):
            hits = hits + cmp[j]
        recip = pl.reciprocal(1e-14 + jnp.sum(hits, axis=0, keepdims=True),
                              approx=False)                          # (1, L), exact

        # Fused gather + adjacency-mix + scatter, K row-blocks at a time:
        #   w_i[(g,m), l]  = sum_j adj[m,i,j] * [idx_off[g,m,j] == l]   (VPU, full lanes)
        #   nn_i           = w_i @ x_g                                   (MXU)
        #   acc[d, l]     += sum_{g,m} nn_i[(g,m), d] * cmp_i[(g,m), l]  (MXU)
        acc = jnp.zeros((D, L), jnp.float32)
        for i in range(K):
            w_i = a_col[i * K] * cmp[0]
            for j in range(1, K):
                w_i = w_i + a_col[i * K + j] * cmp[j]
            nn_i = jnp.dot(w_i, x_g, preferred_element_type=jnp.float32)       # (GM, D)
            acc = acc + jax.lax.dot_general(nn_i, cmp[i], dn,
                                            preferred_element_type=jnp.float32)  # (D, L)

        # Per-node normalization: sublane-broadcast of (1, L) over (D, L),
        # then an unmasked, lane-dense store.
        o_ref[grp] = (acc * recip).astype(o_ref.dtype)
        return carry

    jax.lax.fori_loop(0, n_groups, body, 0,
                      unroll=(n_groups if n_groups <= 2 else 2))


def _plan_blocks(ng_total, per_group_bytes, adj_bytes):
    """Pick groups-per-grid-step and a vmem limit from the chip's VMEM capacity."""
    try:
        vmem_cap = int(pltpu.get_tpu_info().vmem_capacity_bytes)
    except Exception:
        vmem_cap = 64 * 1024 * 1024                      # conservative fallback
    small_vmem = vmem_cap <= 64 * 1024 * 1024            # v7x-like: 64 MiB VMEM, 2 TCs
    budget = (20 if small_vmem else 64) * 1024 * 1024    # double-buffered block budget
    cap = max(1, budget // max(2 * per_group_bytes, 1))

    divisors = [t for t in range(1, ng_total + 1) if ng_total % t == 0]
    fitting = [t for t in divisors if t <= cap] or [1]
    gps = max(fitting)
    if small_vmem:
        # Two TensorCores: prefer an even number (>= 2) of grid steps so the
        # "parallel" axis splits evenly across both cores.
        good = [t for t in fitting if (ng_total // t) >= 2 and (ng_total // t) % 2 == 0]
        if good:
            gps = max(good)

    vmem_limit = 2 * gps * per_group_bytes + 2 * adj_bytes + (8 << 20)
    vmem_limit = int(min(max(vmem_limit, 32 << 20),
                         (48 << 20) if small_vmem else (96 << 20)))
    return gps, vmem_limit


def feature_aggregation_pallas(x, adj, batch_indices, time_indices, indices,
                               *, groups_per_step=None):
    """x: (B,T,N,D), adj: (M,K,K), indices: (B,T,M,K) int, M == N.  Returns f32."""
    B, T, N, D = x.shape
    _, _, M, K = indices.shape
    BT = B * T

    # Best-effort check that batch/time indices are the standard broadcast aranges
    # (the only case the kernel implements; skipped for traced inputs).
    std_ok = True
    try:
        bi = np.broadcast_to(np.asarray(batch_indices), (B, T, M, K))
        ti = np.broadcast_to(np.asarray(time_indices), (B, T, M, K))
        std_ok = (np.array_equal(bi, np.broadcast_to(
                      np.arange(B)[:, None, None, None], (B, T, M, K))) and
                  np.array_equal(ti, np.broadcast_to(
                      np.arange(T)[None, :, None, None], (B, T, M, K))))
    except Exception:  # tracers / abstract values: assume the standard case
        std_ok = True
    if not std_ok:
        raise NotImplementedError(
            "feature_aggregation_pallas only supports broadcast-arange "
            "batch_indices/time_indices")

    # Lane batching: G (b,t) slices share one one-hot so its width G*N ~ 128 lanes.
    g_cap = min(max(1, 128 // N), BT)
    G = 1
    for cand in range(g_cap, 0, -1):
        if BT % cand == 0:
            G = cand
            break
    NG = BT // G
    L = G * N

    idx_flat = indices.reshape(BT, M, K).astype(jnp.int32)
    offs = (jnp.arange(BT, dtype=jnp.int32) % G) * N
    idx_in = (idx_flat + offs[:, None, None]).reshape(NG, G * M, K)
    x_in = x.reshape(NG, G * N, D)                      # native dtype; cast in-kernel
    adj_big = jnp.tile(adj.reshape(M, K * K).astype(jnp.float32), (G, 1))  # (G*M, K*K)

    itemsize = jnp.dtype(x.dtype).itemsize
    per_group = G * M * K * 4 + G * N * D * itemsize + D * G * N * 4
    adj_bytes = G * M * K * K * 4
    gps_auto, vmem_limit = _plan_blocks(NG, per_group, adj_bytes)
    gps = gps_auto if groups_per_step is None else groups_per_step
    assert NG % gps == 0, (NG, gps)

    out = pl.pallas_call(
        feature_agg_kernel,
        out_shape=jax.ShapeDtypeStruct((NG, D, L), jnp.float32),
        grid=(NG // gps,),
        in_specs=[
            pl.BlockSpec((gps, G * M, K), lambda i: (i, 0, 0)),
            pl.BlockSpec((gps, G * N, D), lambda i: (i, 0, 0)),
            pl.BlockSpec((G * M, K * K), lambda i: (0, 0)),
        ],
        out_specs=pl.BlockSpec((gps, D, L), lambda i: (i, 0, 0)),
        compiler_params=pltpu.CompilerParams(
            dimension_semantics=("parallel",),
            vmem_limit_bytes=vmem_limit,
        ),
    )(idx_in, x_in, adj_big)

    # (NG, D, G*N) -> (B, T, N, D): wrapper-side layout plumbing only.
    out = out.reshape(NG, D, G, N).transpose(0, 2, 3, 1).reshape(B, T, N, D)
    return out


def feature_aggregation_reference(x, adj, indices):
    """Pure-JAX reference matching the PyTorch forward."""
    B, T, N, D = x.shape
    _, _, M, K = indices.shape
    bi = jnp.arange(B)[:, None, None, None]
    ti = jnp.arange(T)[None, :, None, None]
    selected = x[bi, ti, indices]                                     # (B,T,M,K,D)
    node_new = jnp.einsum('mij,btmjd->btmid', adj, selected)          # (B,T,M,K,D)
    node_new = node_new.reshape(B, T, M * K, D)
    idx_flat = indices.reshape(B, T, M * K)

    dict1 = jnp.zeros((B, T, N, D), jnp.float32)
    dict1 = jax.vmap(jax.vmap(lambda d, i, v: d.at[i].add(v)))(dict1, idx_flat, node_new)

    counts = jnp.full((B, T, N), 1e-14, jnp.float32)
    counts = jax.vmap(jax.vmap(lambda c, i: c.at[i].add(1.0)))(counts, idx_flat)

    return dict1 / counts[..., None]


if __name__ == "__main__":
    B, T, N, D, K = 2, 4, 8, 32, 3
    M = N  # each node has K neighbors; indices per (b, t) is (N, K)

    key = jax.random.PRNGKey(0)
    k1, k2, k3 = jax.random.split(key, 3)
    x = jax.random.normal(k1, (B, T, N, D), dtype=jnp.float32)
    adj = jax.random.normal(k2, (M, K, K), dtype=jnp.float32)
    indices = jax.random.randint(k3, (B, T, M, K), 0, N, dtype=jnp.int32)

    # The standard broadcast index tensors the module is called with.
    batch_indices = jnp.arange(B)[:, None, None, None]
    time_indices = jnp.arange(T)[None, :, None, None]

    out = feature_aggregation_pallas(x, adj, batch_indices, time_indices, indices)
    out = jax.block_until_ready(out)

    ref = feature_aggregation_reference(x, adj, indices)
    assert out.shape == (B, T, N, D)
    assert jnp.allclose(out, ref, rtol=1e-5, atol=1e-5), "Pallas kernel mismatch vs reference"

    print("KERNEL_OK")
</pallas_src>

<mosaic_0001>
module attributes {stable_mosaic.version = 11 : i64} {
  func.func @feature_agg_kernel(%arg0: i32, %arg1: memref<1x64x3xi32, #tpu.memory_space<vmem>>, %arg2: memref<1x64x32xf32, #tpu.memory_space<vmem>>, %arg3: memref<64x9xf32, #tpu.memory_space<vmem>>, %arg4: memref<1x32x64xf32, #tpu.memory_space<vmem>>) attributes {dimension_semantics = [#tpu.dimension_semantics<parallel>], iteration_bounds = array<i64: 1>, scalar_prefetch = 0 : i64, scratch_operands = 0 : i64, tpu.core_type = #tpu.core_type<tc>, window_params = [{transform_indices = @transform_0, window_bounds = array<i64: 1, 64, 3>}, {transform_indices = @transform_1, window_bounds = array<i64: 1, 64, 32>}, {pipeline_mode = #tpu.pipeline_mode<synchronous>, transform_indices = @transform_2, window_bounds = array<i64: 64, 9>}, {transform_indices = @transform_3, window_bounds = array<i64: 1, 32, 64>}]} {
    %c0 = arith.constant 0 : index
    %c0_0 = arith.constant 0 : index
    %0 = vector.load %arg3[%c0, %c0_0] : memref<64x9xf32, #tpu.memory_space<vmem>>, vector<64x9xf32>
    %1 = vector.extract_strided_slice %0 {offsets = [0, 0], sizes = [64, 1], strides = [1, 1]} : vector<64x9xf32> to vector<64x1xf32>
    %2 = vector.extract_strided_slice %0 {offsets = [0, 1], sizes = [64, 1], strides = [1, 1]} : vector<64x9xf32> to vector<64x1xf32>
    %3 = vector.extract_strided_slice %0 {offsets = [0, 2], sizes = [64, 1], strides = [1, 1]} : vector<64x9xf32> to vector<64x1xf32>
    %4 = vector.extract_strided_slice %0 {offsets = [0, 3], sizes = [64, 1], strides = [1, 1]} : vector<64x9xf32> to vector<64x1xf32>
    %5 = vector.extract_strided_slice %0 {offsets = [0, 4], sizes = [64, 1], strides = [1, 1]} : vector<64x9xf32> to vector<64x1xf32>
    %6 = vector.extract_strided_slice %0 {offsets = [0, 5], sizes = [64, 1], strides = [1, 1]} : vector<64x9xf32> to vector<64x1xf32>
    %7 = vector.extract_strided_slice %0 {offsets = [0, 6], sizes = [64, 1], strides = [1, 1]} : vector<64x9xf32> to vector<64x1xf32>
    %8 = vector.extract_strided_slice %0 {offsets = [0, 7], sizes = [64, 1], strides = [1, 1]} : vector<64x9xf32> to vector<64x1xf32>
    %9 = vector.extract_strided_slice %0 {offsets = [0, 8], sizes = [64, 1], strides = [1, 1]} : vector<64x9xf32> to vector<64x1xf32>
    %10 = tpu.iota {dimensions = array<i32: 1>} : vector<64x64xi32>
    %c0_i32 = arith.constant 0 : i32
    %11 = arith.index_cast %c0_i32 : i32 to index
    %c0_1 = arith.constant 0 : index
    %c0_2 = arith.constant 0 : index
    %12 = vector.load %arg1[%11, %c0_1, %c0_2] : memref<1x64x3xi32, #tpu.memory_space<vmem>>, vector<1x64x3xi32>
    %13 = vector.shape_cast %12 : vector<1x64x3xi32> to vector<64x3xi32>
    %14 = arith.index_cast %c0_i32 : i32 to index
    %c0_3 = arith.constant 0 : index
    %c0_4 = arith.constant 0 : index
    %15 = vector.load %arg2[%14, %c0_3, %c0_4] : memref<1x64x32xf32, #tpu.memory_space<vmem>>, vector<1x64x32xf32>
    %16 = vector.shape_cast %15 : vector<1x64x32xf32> to vector<64x32xf32>
    %17 = vector.extract_strided_slice %13 {offsets = [0, 0], sizes = [64, 1], strides = [1, 1]} : vector<64x3xi32> to vector<64x1xi32>
    %18 = vector.broadcast %17 : vector<64x1xi32> to vector<64x64xi32>
    %19 = arith.cmpi eq, %18, %10 : vector<64x64xi32>
    %20 = arith.extui %19 : vector<64x64xi1> to vector<64x64xi32>
    %21 = arith.sitofp %20 : vector<64x64xi32> to vector<64x64xf32>
    %22 = vector.extract_strided_slice %13 {offsets = [0, 1], sizes = [64, 1], strides = [1, 1]} : vector<64x3xi32> to vector<64x1xi32>
    %23 = vector.broadcast %22 : vector<64x1xi32> to vector<64x64xi32>
    %24 = arith.cmpi eq, %23, %10 : vector<64x64xi32>
    %25 = arith.extui %24 : vector<64x64xi1> to vector<64x64xi32>
    %26 = arith.sitofp %25 : vector<64x64xi32> to vector<64x64xf32>
    %27 = vector.extract_strided_slice %13 {offsets = [0, 2], sizes = [64, 1], strides = [1, 1]} : vector<64x3xi32> to vector<64x1xi32>
    %28 = vector.broadcast %27 : vector<64x1xi32> to vector<64x64xi32>
    %29 = arith.cmpi eq, %28, %10 : vector<64x64xi32>
    %30 = arith.extui %29 : vector<64x64xi1> to vector<64x64xi32>
    %31 = arith.sitofp %30 : vector<64x64xi32> to vector<64x64xf32>
    %32 = arith.addf %21, %26 : vector<64x64xf32>
    %33 = arith.addf %32, %31 : vector<64x64xf32>
    %cst = arith.constant dense<0.000000e+00> : vector<64xf32>
    %34 = vector.multi_reduction <add>, %33, %cst [0] : vector<64x64xf32> to vector<64xf32>
    %35 = vector.shape_cast %34 : vector<64xf32> to vector<1x64xf32>
    %cst_5 = arith.constant 9.99999982E-15 : f32
    %36 = vector.broadcast %cst_5 : f32 to vector<1x64xf32>
    %37 = arith.addf %36, %35 : vector<1x64xf32>
    %38 = tpu.reciprocal %37 : vector<1x64xf32> -> vector<1x64xf32>
    %cst_6 = arith.constant 0.000000e+00 : f32
    %39 = vector.broadcast %cst_6 : f32 to vector<32x64xf32>
    %40 = vector.broadcast %1 : vector<64x1xf32> to vector<64x64xf32>
    %41 = arith.mulf %40, %21 : vector<64x64xf32>
    %42 = vector.broadcast %2 : vector<64x1xf32> to vector<64x64xf32>
    %43 = arith.mulf %42, %26 : vector<64x64xf32>
    %44 = arith.addf %41, %43 : vector<64x64xf32>
    %45 = vector.broadcast %3 : vector<64x1xf32> to vector<64x64xf32>
    %46 = arith.mulf %45, %31 : vector<64x64xf32>
    %47 = arith.addf %44, %46 : vector<64x64xf32>
    %cst_7 = arith.constant dense<0.000000e+00> : vector<64x32xf32>
    %48 = tpu.matmul %47, %16, %cst_7 {dimension_numbers = #tpu.dot_dimension_numbers<[1], [0], [0], [1], [0, 0, 1, 1], [], []>} : vector<64x64xf32>, vector<64x32xf32>, vector<64x32xf32> -> vector<64x32xf32>
    %cst_8 = arith.constant dense<0.000000e+00> : vector<32x64xf32>
    %49 = tpu.matmul %48, %21, %cst_8 {dimension_numbers = #tpu.dot_dimension_numbers<[0], [0], [1], [1], [0, 1, 1, 1], [], []>} : vector<64x32xf32>, vector<64x64xf32>, vector<32x64xf32> -> vector<32x64xf32>
    %50 = arith.addf %39, %49 : vector<32x64xf32>
    %51 = vector.broadcast %4 : vector<64x1xf32> to vector<64x64xf32>
    %52 = arith.mulf %51, %21 : vector<64x64xf32>
    %53 = vector.broadcast %5 : vector<64x1xf32> to vector<64x64xf32>
    %54 = arith.mulf %53, %26 : vector<64x64xf32>
    %55 = arith.addf %52, %54 : vector<64x64xf32>
    %56 = vector.broadcast %6 : vector<64x1xf32> to vector<64x64xf32>
    %57 = arith.mulf %56, %31 : vector<64x64xf32>
    %58 = arith.addf %55, %57 : vector<64x64xf32>
    %cst_9 = arith.constant dense<0.000000e+00> : vector<64x32xf32>
    %59 = tpu.matmul %58, %16, %cst_9 {dimension_numbers = #tpu.dot_dimension_numbers<[1], [0], [0], [1], [0, 0, 1, 1], [], []>} : vector<64x64xf32>, vector<64x32xf32>, vector<64x32xf32> -> vector<64x32xf32>
    %cst_10 = arith.constant dense<0.000000e+00> : vector<32x64xf32>
    %60 = tpu.matmul %59, %26, %cst_10 {dimension_numbers = #tpu.dot_dimension_numbers<[0], [0], [1], [1], [0, 1, 1, 1], [], []>} : vector<64x32xf32>, vector<64x64xf32>, vector<32x64xf32> -> vector<32x64xf32>
    %61 = arith.addf %50, %60 : vector<32x64xf32>
    %62 = vector.broadcast %7 : vector<64x1xf32> to vector<64x64xf32>
    %63 = arith.mulf %62, %21 : vector<64x64xf32>
    %64 = vector.broadcast %8 : vector<64x1xf32> to vector<64x64xf32>
    %65 = arith.mulf %64, %26 : vector<64x64xf32>
    %66 = arith.addf %63, %65 : vector<64x64xf32>
    %67 = vector.broadcast %9 : vector<64x1xf32> to vector<64x64xf32>
    %68 = arith.mulf %67, %31 : vector<64x64xf32>
    %69 = arith.addf %66, %68 : vector<64x64xf32>
    %cst_11 = arith.constant dense<0.000000e+00> : vector<64x32xf32>
    %70 = tpu.matmul %69, %16, %cst_11 {dimension_numbers = #tpu.dot_dimension_numbers<[1], [0], [0], [1], [0, 0, 1, 1], [], []>} : vector<64x64xf32>, vector<64x32xf32>, vector<64x32xf32> -> vector<64x32xf32>
    %cst_12 = arith.constant dense<0.000000e+00> : vector<32x64xf32>
    %71 = tpu.matmul %70, %31, %cst_12 {dimension_numbers = #tpu.dot_dimension_numbers<[0], [0], [1], [1], [0, 1, 1, 1], [], []>} : vector<64x32xf32>, vector<64x64xf32>, vector<32x64xf32> -> vector<32x64xf32>
    %72 = arith.addf %61, %71 : vector<32x64xf32>
    %73 = vector.broadcast %38 : vector<1x64xf32> to vector<32x64xf32>
    %74 = arith.mulf %72, %73 : vector<32x64xf32>
    %75 = arith.index_cast %c0_i32 : i32 to index
    %c0_13 = arith.constant 0 : index
    %c0_14 = arith.constant 0 : index
    %76 = vector.load %arg4[%75, %c0_13, %c0_14] : memref<1x32x64xf32, #tpu.memory_space<vmem>>, vector<1x32x64xf32>
    %77 = vector.shape_cast %76 : vector<1x32x64xf32> to vector<32x64xf32>
    %78 = vector.shape_cast %74 : vector<32x64xf32> to vector<1x32x64xf32>
    tpu.vector_store %arg4[%75, %c0_13, %c0_14], %78 {strides = array<i32>} : memref<1x32x64xf32, #tpu.memory_space<vmem>>, vector<1x32x64xf32>,
    %c1_i32 = arith.constant 1 : i32
    return
  }
  func.func @transform_0(%arg0: i32) -> (i32, i32, i32) {
    %c0_i32 = arith.constant 0 : i32
    %c0_i32_0 = arith.constant 0 : i32
    %c0_i32_1 = arith.constant 0 : i32
    return %arg0, %c0_i32, %c0_i32_0 : i32, i32, i32
  }
  func.func @transform_1(%arg0: i32) -> (i32, i32, i32) {
    %c0_i32 = arith.constant 0 : i32
    %c0_i32_0 = arith.constant 0 : i32
    %c0_i32_1 = arith.constant 0 : i32
    return %arg0, %c0_i32, %c0_i32_0 : i32, i32, i32
  }
  func.func @transform_2(%arg0: i32) -> (i32, i32) {
    %c0_i32 = arith.constant 0 : i32
    %c0_i32_0 = arith.constant 0 : i32
    %c0_i32_1 = arith.constant 0 : i32
    return %c0_i32, %c0_i32_0 : i32, i32
  }
  func.func @transform_3(%arg0: i32) -> (i32, i32, i32) {
    %c0_i32 = arith.constant 0 : i32
    %c0_i32_0 = arith.constant 0 : i32
    %c0_i32_1 = arith.constant 0 : i32
    return %arg0, %c0_i32, %c0_i32_0 : i32, i32, i32
  }
}

</mosaic_0001>

<bundles_post_ra>
// kernel: tpu_custom_call.1
= control target key start
LH: loop header
LB: loop body
LE: loop exit
PB: predicated region body
PF: predicated region fallthrough
CT: control target
= control target key end

     0   :  { %v2220_v3 = vmov 0   ;;  %s2216_s0 = inlined_call_operand.vmem [shape: s32[1,64,3], index: 0, kind: input, shape index: {}]   ;;  %s2217_s1 = inlined_call_operand.vmem [shape: f32[1,64,32], index: 1, kind: input, shape index: {}]   ;;  %s2218_s2 = inlined_call_operand.vmem [shape: f32[64,9], index: 2, kind: input, shape index: {}]   ;;  %s2219_s3 = inlined_call_operand.hbm [shape: f32[1,32,64], index: 3, kind: output, shape index: {}]  }
   0x1   :  { %v1353_v0 = vld [vmem:[%s2216_s0 + $0x20] sm:$0xff]  ;;  %v27_v1 = vld [vmem:[%s2216_s0 + $0x10] sm:$0xff]  ;;  %1214 = vset.pattern.permute.xlu2 %v2220_v3  ;;  %1213 = vset.pattern.permute.xlu1 %v2220_v3 }
   0x2   :  { %v25_v2 = vld [vmem:[%s2216_s0] sm:$0xff]  ;;  %1212 = vset.pattern.permute.xlu0 %v2220_v3  ;;  %54 = vperm.xlu2 %1214, %v1353_v0  }
   0x3   :  { %8 = vsyncpa [#allocation3], 0  ;;  %48 = vperm.xlu1 %1213, %v27_v1   ;;  %42 = vperm.xlu0 %1212, %v25_v2   ;;  %v1368_v4 = vld [vmem:[%s2216_s0 + $0x28] sm:$0xff]  ;;  %v28_v5 = vld [vmem:[%s2216_s0 + $0x18] sm:$0xff]  ;;  %v2223_v9 = vmov 1   ;;  %v2225_v11 = vmov 2   ;;  %v23_v35 = vlaneseq }
   0x4   :  { %v26_v6 = vld [vmem:[%s2216_s0 + $0x8] sm:$0xff]  ;;  %v1380_v7 = vld [vmem:[%s2216_s0 + $0x38] sm:$0xff]  ;;  %v1385_v8 = vld [vmem:[%s2216_s0 + $0x30] sm:$0xff]  ;;  %v1319_v12 = vmov 3   ;;  %v1320_v13 = vmov 4   ;;  %v1321_v15 = vmov 5  }
   0x5   :  { %v1395_v10 = vld [vmem:[%s2218_s2] sm:$0xff]  ;;  %v1405_v14 = vld [vmem:[%s2218_s2 + $0x8] sm:$0xff]  ;;  %v1420_v16 = vld [vmem:[%s2218_s2 + $0x10] sm:$0xff]  ;;  %v1548_v38 = vand.u32 127, %v23_v35  ;;  %v2229_v43 = vmov 1.0   ;;  %v2221_v48 = vmov 6  }
   0x6   :  { %v1429_v17 = vld [vmem:[%s2218_s2 + $0x20] sm:$0xff]  ;;  %v1440_v18 = vld [vmem:[%s2218_s2 + $0x28] sm:$0xff]  ;;  %v1445_v19 = vld [vmem:[%s2218_s2 + $0x18] sm:$0xff]  ;;  %v2232_v51 = vmov 0.0   ;;  %vm201_vm11 = vcmask 523264   ;;  %s1086_s6 = sshll.u32 %s2219_s3, 4  ;;  %s1087_s6 = int_to_ptr.hbm [resolvable:$true] %s1086_s6 }
   0x7   :  { %v1455_v20 = vld [vmem:[%s2218_s2 + $0x30] sm:$0xff]  ;;  %v1468_v22 = vld [vmem:[%s2218_s2 + $0x38] sm:$0xff]  ;;  %v1514_v30 = vld [vmem:[%s2217_s1 + $0x28] sm:$0xff]  ;;  %s1328_s7 = smov 128   ;;  %s1329_s8 = smov 8  }
   0x8   :  { %v1496_v28 = vld [vmem:[%s2217_s1 + $0x38] sm:$0xff]  ;;  %v1507_v29 = vld [vmem:[%s2217_s1 + $0x30] sm:$0xff]  ;;  %v1525_v33 = vld [vmem:[%s2217_s1 + $0x20] sm:$0xff] }
   0x9   :  { %615 = vmatpush.msra.mxu1 %v1496_v28  ;;  %414 = vmatpush.msra.mxu0 %v1496_v28  ;;  %v1532_v34 = vld [vmem:[%s2217_s1 + $0x18] sm:$0xff]  ;;  %v1543_v37 = vld [vmem:[%s2217_s1 + $0x10] sm:$0xff]  ;;  %v1554_v39 = vld [vmem:[%s2217_s1 + $0x8] sm:$0xff] }
   0xa   :  { %57 = vperm.xlu2 %1214, %v1368_v4   ;;  %v1570_v42 = vld [vmem:[%s2217_s1] sm:$0xff]  ;;  %s1327_s1 = smov [#allocation2]  }
   0xb   :  { %51 = vperm.xlu1 %1213, %v28_v5   ;;  %45 = vperm.xlu0 %1212, %v26_v6   ;;  %s1084_s30 = sshll.u32 %s1327_s1, 4  ;;  %s1085_s30 = int_to_ptr.vmem [resolvable:$true] %s1084_s30 }
   0xc   :  { %616 = vmatpush.msra.mxu1 %v1507_v29  ;;  %415 = vmatpush.msra.mxu0 %v1507_v29 }
   0xe   :  { %617 = vmatpush.msra.mxu1 %v1514_v30  ;;  %416 = vmatpush.msra.mxu0 %v1514_v30 }
  0x10   :  { %618 = vmatpush.msra.mxu1 %v1525_v33  ;;  %417 = vmatpush.msra.mxu0 %v1525_v33 }
  0x12   :  { %1215 = vset.pattern.permute.xlu2 %v2223_v9  ;;  %619 = vmatpush.msra.mxu1 %v1532_v34 }
  0x13   :  { %63 = vperm.xlu1 %1213, %v1380_v7   ;;  %60 = vperm.xlu0 %1212, %v1385_v8  }
  0x14   :  { %90 = vperm.xlu2 %1215, %v25_v2   ;;  %418 = vmatpush.msra.mxu0 %v1532_v34 }
  0x15   :  { %620 = vmatpush.msra.mxu1 %v1543_v37 }
  0x16   :  { %419 = vmatpush.msra.mxu0 %v1543_v37 }
  0x17   :  { %621 = vmatpush.msra.mxu1 %v1554_v39 }
  0x18   :  { %420 = vmatpush.msra.mxu0 %v1554_v39 }
  0x19   :  { %622 = vmatpush.msra.mxu1 %v1570_v42 }
  0x1a   :  { %421 = vmatpush.msra.mxu0 %v1570_v42 }
  0x1b   :  { %1217 = vset.pattern.permute.xlu1 %v2223_v9  ;;  %1216 = vset.pattern.permute.xlu0 %v2223_v9 }
  0x1c   :  { %96 = vperm.xlu1 %1217, %v27_v1   ;;  %99 = vperm.xlu2 %1215, %v28_v5  }
  0x1d   :  { %93 = vperm.xlu0 %1216, %v26_v6  }
  0x24   :  { %1218 = vset.pattern.permute.xlu1 %v2225_v11  ;;  %1219 = vset.pattern.permute.xlu2 %v1319_v12 }
  0x25   :  { %1220 = vset.pattern.permute.xlu0 %v1320_v13  ;;  %138 = vperm.xlu1 %1218, %v25_v2  }
  0x26   :  { %488 = vperm.xlu0 %1220, %v1395_v10   ;;  %448 = vperm.xlu2 %1219, %v1395_v10  }
  0x2d   :  { %1221 = vset.pattern.permute.xlu1 %v1321_v15 }
  0x2e   :  { %1225 = vset.pattern.permute.xlu0 %v1321_v15  ;;  %1222 = vset.pattern.permute.xlu2 %v2225_v11 }
  0x2f   :  { %536 = vperm.xlu1 %1221, %v1395_v10   ;;  %540 = vperm.xlu0 %1225, %v1405_v14  }
  0x30   :  { %141 = vperm.xlu2 %1222, %v26_v6  }
  0x37   :  { %1223 = vset.pattern.permute.xlu1 %v1319_v12  ;;  %1230 = vset.pattern.permute.xlu0 %v2225_v11 }
  0x38   :  { %1224 = vset.pattern.permute.xlu2 %v1320_v13  ;;  %452 = vperm.xlu1 %1223, %v1405_v14  }
  0x39   :  { %147 = vperm.xlu0 %1230, %v28_v5   ;;  %492 = vperm.xlu2 %1224, %v1405_v14  }
  0x40   :  { %1226 = vset.pattern.permute.xlu1 %v2225_v11 }
  0x41   :  { %150 = vperm.xlu0 %1230, %v1353_v0   ;;  %1227 = vset.pattern.permute.xlu2 %v1319_v12 }
  0x42   :  { %144 = vperm.xlu1 %1226, %v27_v1   ;;  %456 = vperm.xlu2 %1227, %v1420_v16  }
  0x49   :  { %1237 = vset.pattern.permute.xlu0 %v1321_v15 }
  0x4a   :  { %1228 = vset.pattern.permute.xlu1 %v1320_v13  ;;  %552 = vperm.xlu0 %1237, %v1429_v17  }
  0x4b   :  { %1229 = vset.pattern.permute.xlu2 %v1321_v15  ;;  %496 = vperm.xlu1 %1228, %v1420_v16  }
  0x4c   :  { %544 = vperm.xlu2 %1229, %v1420_v16  }
  0x52   :  { %556 = vperm.xlu0 %1237, %v1440_v18  }
  0x53   :  { %1231 = vset.pattern.permute.xlu1 %v1319_v12 }
  0x54   :  { %1232 = vset.pattern.permute.xlu2 %v1320_v13  ;;  %460 = vperm.xlu1 %1231, %v1445_v19  }
  0x55   :  { %500 = vperm.xlu2 %1232, %v1445_v19  }
  0x5a   :  { %1244 = vset.pattern.permute.xlu0 %v1319_v12 }
  0x5b   :  { %472 = vperm.xlu0 %1244, %v1455_v20  }
  0x5c   :  { %1233 = vset.pattern.permute.xlu1 %v1321_v15  ;;  %v1460_v21 = vpop.permute.xlu2 %54 }
  0x5d   :  { %1234 = vset.pattern.permute.xlu2 %v2223_v9  ;;  %548 = vperm.xlu1 %1233, %v1445_v19   ;;  %vm69_vm3 = vcmp.eq.s32.totalorder %v1460_v21, %v1548_v38 }
  0x5e   :  { %102 = vperm.xlu2 %1234, %v1353_v0  }
  0x63   :  { %476 = vperm.xlu0 %1244, %v1468_v22  }
  0x64   :  { %v1471_v23 = vpop.permute.xlu2 %57 }
  0x65   :  { %1235 = vset.pattern.permute.xlu1 %v1319_v12  ;;  %vm70_vm2 = vcmp.eq.s32.totalorder %v1471_v23, %v1548_v38 }
  0x66   :  { %1236 = vset.pattern.permute.xlu2 %v1320_v13  ;;  %464 = vperm.xlu1 %1235, %v1429_v17  }
  0x67   :  { %504 = vperm.xlu2 %1236, %v1429_v17  }
  0x6b   :  { %1255 = vset.pattern.permute.xlu0 %v2225_v11 }
  0x6c   :  { %339 = vperm.xlu0 %1255, %v1405_v14  }
  0x6e   :  { %1238 = vset.pattern.permute.xlu1 %v2223_v9  ;;  %v1480_v24 = vpop.permute.xlu2 %90 }
  0x6f   :  { %1239 = vset.pattern.permute.xlu2 %v2225_v11  ;;  %105 = vperm.xlu1 %1238, %v1368_v4   ;;  %vm2231_vm8 = vcmp.eq.s32.totalorder %v1480_v24, %v1548_v38 }
  0x70   :  { %153 = vperm.xlu2 %1239, %v1368_v4   ;;  %v1647_v53 = vsel %vm2231_vm8, 1.0, %v2232_v51 }
  0x74   :  { %1256 = vset.pattern.permute.xlu0 %v2220_v3 }
  0x75   :  { %240 = vperm.xlu0 %1256, %v1395_v10   ;;  %v1487_v25 = vpop.permute.xlu1 %48  ;;  %v1489_v26 = vpop.permute.xlu0 %42 }
  0x76   :  { %v1491_v27 = vpop.permute.xlu2 %99  ;;  %vm67_vm5 = vcmp.eq.s32.totalorder %v1487_v25, %v1548_v38  ;;  %vm65_vm7 = vcmp.eq.s32.totalorder %v1489_v26, %v1548_v38 }
  0x77   :  { %1240 = vset.pattern.permute.xlu1 %v1319_v12  ;;  %v1641_v52 = vsel %vm65_vm7, 1.0, %v2232_v51  ;;  %vm116_vm15 = vcmp.eq.s32.totalorder %v1491_v27, %v1548_v38 }
  0x78   :  { %1241 = vset.pattern.permute.xlu2 %v1320_v13  ;;  %468 = vperm.xlu1 %1240, %v1440_v18  }
  0x79   :  { %508 = vperm.xlu2 %1241, %v1440_v18  }
  0x7d   :  { %260 = vperm.xlu0 %1256, %v1429_v17   ;;  %v1517_v31 = vpop.permute.xlu1 %51  ;;  %v1519_v32 = vpop.permute.xlu0 %45 }
  0x7e   :  { %vm68_vm4 = vcmp.eq.s32.totalorder %v1517_v31, %v1548_v38  ;;  %vm66_vm6 = vcmp.eq.s32.totalorder %v1519_v32, %v1548_v38 }
  0x7f   :  { %v1684_v2 = vsel %vm66_vm6, 1.0, %v2232_v51 }
  0x80   :  { %1242 = vset.pattern.permute.xlu1 %v2223_v9  ;;  %v1535_v36 = vpop.permute.xlu2 %448 }
  0x81   :  { %1243 = vset.pattern.permute.xlu2 %v2225_v11  ;;  %108 = vperm.xlu1 %1242, %v1385_v8   ;;  %v479_v54 = vmul.f32 %v1641_v52, %v1535_v36 }
  0x82   :  { %156 = vperm.xlu2 %1243, %v1385_v8  }
  0x85   :  { %265 = vperm.xlu0 %1256, %v1440_v18   ;;  %v1557_v40 = vpop.permute.xlu1 %63  ;;  %v1559_v41 = vpop.permute.xlu0 %60 }
  0x86   :  { %vm71_vm0 = vcmp.eq.s32.totalorder %v1559_v41, %v1548_v38  ;;  %vm72_vm1 = vcmp.eq.s32.totalorder %v1557_v40, %v1548_v38 }
  0x87   :  { %1150 = vmatpush.msk.msra.mxu3 %vm72_vm1, %v2229_v43 }
  0x89   :  { %1245 = vset.pattern.permute.xlu1 %v1320_v13  ;;  %1151 = vmatpush.msk.msra.mxu3 %vm71_vm0, %v2229_v43 }
  0x8a   :  { %1246 = vset.pattern.permute.xlu2 %v1321_v15  ;;  %512 = vperm.xlu1 %1245, %v1455_v20   ;;  %v1587_v44 = vpop.permute.xlu2 %141 }
  0x8b   :  { %560 = vperm.xlu2 %1246, %v1455_v20   ;;  %1152 = vmatpush.msk.msra.mxu3 %vm70_vm2, %v2229_v43  ;;  %vm162_vm12 = vcmp.eq.s32.totalorder %v1587_v44, %v1548_v38 }
  0x8d   :  { %270 = vperm.xlu0 %1256, %v1455_v20   ;;  %1153 = vmatpush.msk.msra.mxu3 %vm69_vm3, %v2229_v43 }
  0x8e   :  { %v1604_v45 = vpop.permute.xlu1 %96 }
  0x8f   :  { %v1606_v46 = vpop.permute.xlu0 %93  ;;  %1154 = vmatpush.msk.msra.mxu3 %vm68_vm4, %v2229_v43  ;;  %vm115_vm13 = vcmp.eq.s32.totalorder %v1604_v45, %v1548_v38 }
  0x90   :  { %vm2236_vm10 = vcmp.eq.s32.totalorder %v1606_v46, %v1548_v38 }
  0x91   :  { %1155 = vmatpush.msk.msra.mxu3 %vm67_vm5, %v2229_v43  ;;  %v1675_v0 = vsel %vm2236_vm10, 1.0, %v2232_v51 }
  0x92   :  { %1247 = vset.pattern.permute.xlu1 %v2223_v9 }
  0x93   :  { %1248 = vset.pattern.permute.xlu2 %v2225_v11  ;;  %111 = vperm.xlu1 %1247, %v1380_v7   ;;  %v493_v47 = vpop.permute.xlu2 %492 }
  0x94   :  { %159 = vperm.xlu2 %1248, %v1380_v7   ;;  %1156 = vmatpush.msk.msra.mxu3 %vm66_vm6, %v2229_v43  ;;  %v520_v1 = vmul.f32 %v1675_v0, %v493_v47  ;;  %v1693_v7 = vsel %vm162_vm12, 1.0, %v2232_v51  ;;  %v1720_v47 = vsel %vm67_vm5, 1.0, %v2232_v51 }
  0x95   :  { %1270 = vset.pattern.permute.xlu0 %v2221_v48 }
  0x96   :  { %799 = vperm.xlu0 %1270, %v1405_v14   ;;  %1157 = vmatpush.msk.msra.mxu3 %vm65_vm7, %v2229_v43 }
  0x97   :  { %v1633_v49 = vpop.permute.xlu1 %138 }
  0x98   :  { %v489_v50 = vpop.permute.xlu0 %488  ;;  %vm161_vm9 = vcmp.eq.s32.totalorder %v1633_v49, %v1548_v38 }
  0x99   :  { %v519_v55 = vmul.f32 %v1647_v53, %v489_v50  ;;  %v1660_v57 = vsel %vm161_vm9, 1.0, %v2232_v51 }
  0x9b   :  { %1249 = vset.pattern.permute.xlu1 %v1320_v13  ;;  %v527_v60 = vadd.f32 %v519_v55, %v479_v54  ;;  %v1732_v54 = vsel %vm115_vm13, 1.0, %v2232_v51 }
  0x9c   :  { %1250 = vset.pattern.permute.xlu2 %v1321_v15  ;;  %516 = vperm.xlu1 %1249, %v1468_v22   ;;  %v457_v56 = vpop.permute.xlu2 %456 }
  0x9d   :  { %564 = vperm.xlu2 %1250, %v1468_v22  }
  0x9e   :  { %803 = vperm.xlu0 %1270, %v1420_v16  }
  0xa1   :  { %v537_v58 = vpop.permute.xlu1 %536  ;;  %v541_v59 = vpop.permute.xlu0 %540 }
  0xa2   :  { %v567_v61 = vmul.f32 %v1660_v57, %v537_v58  ;;  %v568_v8 = vmul.f32 %v1693_v7, %v541_v59  ;;  %v481_v58 = vmul.f32 %v1720_v47, %v457_v56 }
  0xa4   :  { %v575_v62 = vadd.f32 %v567_v61, %v527_v60  ;;  %1251 = vset.pattern.permute.xlu1 %v2223_v9  ;;  %v1325_v61 = vmov 7  }
  0xa5   :  { %1252 = vset.pattern.permute.xlu2 %v2225_v11  ;;  %287 = vperm.xlu1 %1251, %v1395_v10  }
  0xa6   :  { %335 = vperm.xlu2 %1252, %v1395_v10   ;;  %807 = vperm.xlu0 %1270, %v1445_v19   ;;  %v545_v63 = vpop.permute.xlu2 %544 }
  0xa7   :  { %1130 = vmatmul.msk.f32.vlgmr.msra.gmra.mxu1 %vm201_vm11, %v575_v62 }
  0xaa   :  { %v453_v4 = vpop.permute.xlu1 %452 }
  0xab   :  { %v480_v5 = vmul.f32 %v1684_v2, %v453_v4  ;;  %v1687_v6 = vpop.permute.xlu0 %147 }
  0xac   :  { %vm164_vm5 = vcmp.eq.s32.totalorder %v1687_v6, %v1548_v38  ;;  %v2241_v6 = vmov 1  }
  0xad   :  { %v528_v12 = vadd.f32 %v520_v1, %v480_v5  ;;  %1253 = vset.pattern.permute.xlu1 %v2220_v3  ;;  %v1756_v5 = vsel %vm68_vm4, 1.0, %v2232_v51  ;;  %v1772_v31 = vsel %vm164_vm5, 1.0, %v2232_v51 }
  0xae   :  { %1254 = vset.pattern.permute.xlu2 %v2223_v9  ;;  %245 = vperm.xlu1 %1253, %v1405_v14  }
  0xaf   :  { %1273 = vset.pattern.permute.xlu0 %v2223_v9  ;;  %291 = vperm.xlu2 %1254, %v1405_v14   ;;  %v501_v13 = vpop.permute.xlu2 %500  ;;  %v576_v15 = vadd.f32 %v568_v8, %v528_v12  ;;  %v1765_v12 = vsel %vm116_vm15, 1.0, %v2232_v51 }
  0xb0   :  { %299 = vperm.xlu0 %1273, %v1445_v19  }
  0xb1   :  { %1131 = vmatmul.msk.f32.gmra.mxu1 %vm201_vm11, %v576_v15  ;;  %v522_v15 = vmul.f32 %v1765_v12, %v501_v13 }
  0xb3   :  { %v1703_v26 = vpop.permute.xlu0 %150 }
  0xb4   :  { %v1705_v32 = vpop.permute.xlu1 %144  ;;  %vm165_vm4 = vcmp.eq.s32.totalorder %v1703_v26, %v1548_v38 }
  0xb5   :  { %vm163_vm14 = vcmp.eq.s32.totalorder %v1705_v32, %v1548_v38 }
  0xb6   :  { %250 = vperm.xlu1 %1253, %v1420_v16   ;;  %v1726_v50 = vsel %vm163_vm14, 1.0, %v2232_v51 }
  0xb7   :  { %295 = vperm.xlu2 %1254, %v1420_v16   ;;  %v569_v25 = vmul.f32 %v1726_v50, %v545_v63 }
  0xb8   :  { %315 = vperm.xlu0 %1273, %v1468_v22   ;;  %v1710_v35 = vpop.permute.xlu2 %102 }
  0xb9   :  { %vm117_vm6 = vcmp.eq.s32.totalorder %v1710_v35, %v1548_v38 }
  0xbc   :  { %v553_v36 = vpop.permute.xlu0 %552 }
  0xbd   :  { %v497_v55 = vpop.permute.xlu1 %496 }
  0xbe   :  { %v521_v59 = vmul.f32 %v1732_v54, %v497_v55  ;;  %1257 = vset.pattern.permute.xlu1 %v2225_v11 }
  0xbf   :  { %1258 = vset.pattern.permute.xlu2 %v2220_v3  ;;  %343 = vperm.xlu1 %1257, %v1420_v16  }
  0xc0   :  { %v529_v60 = vadd.f32 %v521_v59, %v481_v58  ;;  %1279 = vset.pattern.permute.xlu0 %v1325_v61  ;;  %255 = vperm.xlu2 %1258, %v1445_v19  }
  0xc1   :  { %851 = vperm.xlu0 %1279, %v1429_v17   ;;  %v505_v62 = vpop.permute.xlu2 %504 }
  0xc2   :  { %v577_v56 = vadd.f32 %v569_v25, %v529_v60  ;;  %v2227_v60 = vmov 8  }
  0xc4   :  { %1132 = vmatmul.msk.f32.gmra.mxu1 %vm201_vm11, %v577_v56  ;;  %v557_v1 = vpop.permute.xlu0 %556 }
  0xc6   :  { %v461_v4 = vpop.permute.xlu1 %460 }
  0xc7   :  { %347 = vperm.xlu1 %1257, %v1445_v19   ;;  %v482_v8 = vmul.f32 %v1756_v5, %v461_v4  ;;  %v1792_v4 = vsel %vm69_vm3, 1.0, %v2232_v51 }
  0xc8   :  { %1259 = vset.pattern.permute.xlu2 %v2221_v48 }
  0xc9   :  { %855 = vperm.xlu0 %1279, %v1440_v18   ;;  %795 = vperm.xlu2 %1259, %v1395_v10   ;;  %v530_v59 = vadd.f32 %v522_v15, %v482_v8  ;;  %v1804_v8 = vsel %vm117_vm6, 1.0, %v2232_v51 }
  0xca   :  { %v1750_v63 = vpop.permute.xlu2 %153  ;;  %v523_v21 = vmul.f32 %v1804_v8, %v505_v62 }
  0xcb   :  { %vm166_vm7 = vcmp.eq.s32.totalorder %v1750_v63, %v1548_v38 }
  0xcd   :  { %v1774_v55 = vpop.permute.xlu0 %472 }
  0xcf   :  { %1260 = vset.pattern.permute.xlu1 %v1325_v61  ;;  %v549_v58 = vpop.permute.xlu1 %548 }
  0xd0   :  { %v570_v25 = vmul.f32 %v1772_v31, %v549_v58  ;;  %835 = vperm.xlu1 %1260, %v1395_v10  }
  0xd1   :  { %1283 = vset.pattern.permute.xlu0 %v2221_v48  ;;  %1261 = vset.pattern.permute.xlu2 %v2227_v60 }
  0xd2   :  { %v578_v13 = vadd.f32 %v570_v25, %v530_v59  ;;  %819 = vperm.xlu0 %1283, %v1455_v20   ;;  %883 = vperm.xlu2 %1261, %v1395_v10   ;;  %v1798_v10 = vsel %vm165_vm4, 1.0, %v2232_v51 }
  0xd3   :  { %v509_v56 = vpop.permute.xlu2 %508  ;;  %2237 = vst [vmem:[#allocation5_spill] sm:$0xff] %v1798_v10  ;;  %v571_v58 = vmul.f32 %v1798_v10, %v553_v36  ;;  %v2238_v10 = vmov 1.0  }
  0xd4   :  { %1133 = vmatmul.msk.f32.gmra.mxu1 %vm201_vm11, %v578_v13 }
  0xd5   :  { %v1809_v59 = vpop.permute.xlu0 %476 }
  0xd8   :  { %1262 = vset.pattern.permute.xlu1 %v2223_v9  ;;  %v465_v15 = vpop.permute.xlu1 %464 }
  0xd9   :  { %v483_v25 = vmul.f32 %v1792_v4, %v465_v15  ;;  %303 = vperm.xlu1 %1262, %v1429_v17   ;;  %v1837_v15 = vsel %vm70_vm2, 1.0, %v2232_v51 }
  0xda   :  { %823 = vperm.xlu0 %1283, %v1468_v22  }
  0xdb   :  { %v531_v13 = vadd.f32 %v523_v21, %v483_v25 }
  0xdc   :  { %v157_v3 = vpop.permute.xlu2 %156 }
  0xdd   :  { %v579_v48 = vadd.f32 %v571_v58, %v531_v13  ;;  %v1843_v58 = vsel %vm166_vm7, 1.0, %v2232_v51  ;;  %vm167_vm2 = vcmp.eq.s32.totalorder %v157_v3, %v1548_v38 }
  0xde   :  { %v1820_v36 = vpop.permute.xlu0 %339 }
  0xdf   :  { %1134 = vmatmul.msk.f32.gmra.mxu1 %vm201_vm11, %v579_v48 }
  0xe1   :  { %1263 = vset.pattern.permute.xlu1 %v2225_v11  ;;  %v1816_v9 = vpop.permute.xlu1 %105  ;;  %v572_v11 = vmul.f32 %v1843_v58, %v557_v1  ;;  %v2239_v1 = vmov 8  }
  0xe2   :  { %1287 = vset.pattern.permute.xlu0 %v2227_v60  ;;  %351 = vperm.xlu1 %1263, %v1429_v17   ;;  %vm118_vm3 = vcmp.eq.s32.totalorder %v1816_v9, %v1548_v38 }
  0xe3   :  { %911 = vperm.xlu0 %1287, %v1468_v22   ;;  %v1831_v48 = vsel %vm118_vm3, 1.0, %v2232_v51 }
  0xe4   :  { %v524_v13 = vmul.f32 %v1831_v48, %v509_v56 }
  0xe5   :  { %v561_v62 = vpop.permute.xlu2 %560 }
  0xe7   :  { %v1850_v23 = vpop.permute.xlu0 %240 }
  0xea   :  { %1264 = vset.pattern.permute.xlu1 %v1325_v61  ;;  %v469_v21 = vpop.permute.xlu1 %468 }
  0xeb   :  { %v484_v25 = vmul.f32 %v1837_v15, %v469_v21  ;;  %839 = vperm.xlu1 %1264, %v1405_v14  }
  0xed   :  { %v532_v60 = vadd.f32 %v524_v13, %v484_v25  ;;  %v2242_v13 = vmov 2  }
  0xee   :  { %v160_v43 = vpop.permute.xlu2 %159 }
  0xef   :  { %vm168_vm8 = vcmp.eq.s32.totalorder %v160_v43, %v1548_v38  ;;  %v580_v51 = vadd.f32 %v572_v11, %v532_v60  ;;  %v1871_v11 = vpop.permute.xlu0 %260 }
  0xf0   :  { %1170 = vmatpush.msk.msrb.mxu3 %vm168_vm8, %v2238_v10 }
  0xf1   :  { %1135 = vmatmul.msk.f32.gmra.mxu1 %vm201_vm11, %v580_v51 }
  0xf2   :  { %1171 = vmatpush.msk.msrb.mxu3 %vm167_vm2, %v2238_v10 }
  0xf3   :  { %1265 = vset.pattern.permute.xlu1 %v2239_v1  ;;  %v109_v56 = vpop.permute.xlu1 %108 }
  0xf4   :  { %1172 = vmatpush.msk.msrb.mxu3 %vm166_vm7, %v2238_v10  ;;  %887 = vperm.xlu1 %1265, %v1405_v14   ;;  %vm119_vm10 = vcmp.eq.s32.totalorder %v109_v56, %v1548_v38  ;;  %v2240_v14 = vmov 0.0  }
  0xf5   :  { %v1886_v51 = vsel %vm71_vm0, 1.0, %v2240_v14  ;;  %v1891_v26 = vsel %vm167_vm2, 1.0, %v2240_v14  ;;  %v1901_v32 = vsel %vm119_vm10, 1.0, %v2240_v14  ;;  %v1962_v56 = vsel %vm72_vm1, 1.0, %v2240_v14 }
  0xf6   :  { %1173 = vmatpush.msk.msrb.mxu3 %vm165_vm4, %v2238_v10  ;;  %v485_v63 = vmul.f32 %v1886_v51, %v1774_v55  ;;  %v573_v44 = vmul.f32 %v1891_v26, %v561_v62  ;;  %v1967_v9 = vsel %vm168_vm8, 1.0, %v2240_v14  ;;  %vm2243_vm1 = vcmp.eq.s32.totalorder %v1606_v46, %v1548_v38 }
  0xf7   :  { %v1912_v21 = vpop.permute.xlu0 %265  ;;  %v565_v49 = vpop.permute.xlu2 %564  ;;  %vm2244_vm8 = vmmov %vm2243_vm1  ;;  %v278_v46 = vmul.f32 %v1641_v52, %v1850_v23 }
  0xf8   :  { %1174 = vmatpush.msk.msrb.mxu3 %vm164_vm5, %v2238_v10  ;;  %v574_v35 = vmul.f32 %v1967_v9, %v565_v49 }
  0xfa   :  { %1175 = vmatpush.msk.msrb.mxu3 %vm163_vm14, %v2238_v10 }
  0xfc   :  { %1176 = vmatpush.msk.msrb.mxu3 %vm162_vm12, %v2238_v10  ;;  %1266 = vset.pattern.permute.xlu1 %v2241_v6  ;;  %v513_v41 = vpop.permute.xlu1 %512 }
  0xfd   :  { %v525_v3 = vmul.f32 %v1901_v32, %v513_v41  ;;  %307 = vperm.xlu1 %1266, %v1440_v18  }
  0xfe   :  { %1177 = vmatpush.msk.msrb.mxu3 %vm161_vm9, %v2238_v10  ;;  %vm2245_vm9 = vmmov %vm2243_vm1 }
  0xff   :  { %v533_v60 = vadd.f32 %v525_v3, %v485_v63  ;;  %v1936_v62 = vpop.permute.xlu0 %270  ;;  %v486_v63 = vmul.f32 %v1962_v56, %v1809_v59 }
 0x101   :  { %v581_v25 = vadd.f32 %v573_v44, %v533_v60 }
 0x103   :  { %1136 = vmatmul.msk.f32.gmra.mxu1 %vm201_vm11, %v581_v25 }
 0x105   :  { %1267 = vset.pattern.permute.xlu1 %v2242_v13  ;;  %v112_v55 = vpop.permute.xlu1 %111 }
 0x106   :  { %vm120_vm0 = vcmp.eq.s32.totalorder %v112_v55, %v1548_v38  ;;  %355 = vperm.xlu1 %1267, %v1440_v18  }
 0x107   :  { %1138 = vmatpush.msk.msrb.mxu0 %vm120_vm0, %v2238_v10  ;;  %1182 = vmatpush.msk.msrb.mxu1 %vm120_vm0, %v2238_v10  ;;  %v1977_v41 = vsel %vm120_vm0, 1.0, %v2240_v14  ;;  %v336_v14 = vpop.permute.xlu2 %335 }
 0x108   :  { %1183 = vmatpush.msk.msra.mxu2 %vm120_vm0, %v2238_v10  ;;  %v2020_v3 = vpop.permute.xlu0 %799  ;;  %v366_v60 = vmul.f32 %v1660_v57, %v336_v14 }
 0x109   :  { %1139 = vmatpush.msk.msrb.mxu0 %vm119_vm10, %v2238_v10  ;;  %1184 = vmatpush.msk.msrb.mxu1 %vm119_vm10, %v2238_v10 }
 0x10a   :  { %1185 = vmatpush.msk.msra.mxu2 %vm119_vm10, %v2238_v10  ;;  %vm2246_vm10 = vcmp.eq.s32.totalorder %v1480_v24, %v1548_v38 }
 0x10b   :  { %1140 = vmatpush.msk.msrb.mxu0 %vm118_vm3, %v2238_v10  ;;  %1186 = vmatpush.msk.msrb.mxu1 %vm118_vm3, %v2238_v10  ;;  %vm2247_vm12 = vmmov %vm2246_vm10 }
 0x10c   :  { %1187 = vmatpush.msk.msra.mxu2 %vm118_vm3, %v2238_v10 }
 0x10d   :  { %1141 = vmatpush.msk.msrb.mxu0 %vm117_vm6, %v2238_v10  ;;  %1188 = vmatpush.msk.msrb.mxu1 %vm117_vm6, %v2238_v10 }
 0x10e   :  { %1189 = vmatpush.msk.msra.mxu2 %vm117_vm6, %v2238_v10  ;;  %1268 = vset.pattern.permute.xlu1 %v1325_v61  ;;  %v517_v40 = vpop.permute.xlu1 %516 }
 0x10f   :  { %v526_v43 = vmul.f32 %v1977_v41, %v517_v40  ;;  %843 = vperm.xlu1 %1268, %v1420_v16   ;;  %1142 = vmatpush.msk.msrb.mxu0 %vm116_vm15, %v2238_v10  ;;  %v292_v38 = vpop.permute.xlu2 %291 }
 0x110   :  { %1190 = vmatpush.msk.msrb.mxu1 %vm116_vm15, %v2238_v10  ;;  %1191 = vmatpush.msk.msra.mxu2 %vm116_vm15, %v2238_v10 }
 0x111   :  { %v534_v59 = vadd.f32 %v526_v43, %v486_v63  ;;  %1143 = vmatpush.msk.msrb.mxu0 %vm115_vm13, %v2238_v10 }
 0x112   :  { %1192 = vmatpush.msk.msrb.mxu1 %vm115_vm13, %v2238_v10  ;;  %1193 = vmatpush.msk.msra.mxu2 %vm115_vm13, %v2238_v10  ;;  %vm2248_vm13 = vmmov %vm2246_vm10 }
 0x113   :  { %1144 = vmatpush.msk.msrb.mxu0 %vm2243_vm1, %v2238_v10  ;;  %v582_v27 = vadd.f32 %v574_v35, %v534_v59 }
 0x114   :  { %1194 = vmatpush.msk.msrb.mxu1 %vm2244_vm8, %v2238_v10  ;;  %1195 = vmatpush.msk.msra.mxu2 %vm2245_vm9, %v2238_v10 }
 0x115   :  { %1137 = vmatmul.msk.f32.gmra.mxu1 %vm201_vm11, %v582_v27  ;;  %1145 = vmatpush.msk.msrb.mxu0 %vm2246_vm10, %v2238_v10 }
 0x116   :  { %1196 = vmatpush.msk.msrb.mxu1 %vm2247_vm12, %v2238_v10  ;;  %1197 = vmatpush.msk.msra.mxu2 %vm2248_vm13, %v2238_v10 }
 0x117   :  { %1269 = vset.pattern.permute.xlu1 %v2239_v1  ;;  %v288_v45 = vpop.permute.xlu1 %287 }
 0x118   :  { %962 = vmatpush.msrb.mxu2 %v1496_v28  ;;  %v318_v44 = vmul.f32 %v1647_v53, %v288_v45  ;;  %891 = vperm.xlu1 %1269, %v1420_v16   ;;  %v2046_v28 = vpop.permute.xlu0 %803 }
 0x11a   :  { %963 = vmatpush.msrb.mxu2 %v1507_v29  ;;  %v326_v25 = vadd.f32 %v318_v44, %v278_v46  ;;  %v319_v29 = vmul.f32 %v1675_v0, %v292_v38 }
 0x11c   :  { %964 = vmatpush.msrb.mxu2 %v1514_v30  ;;  %v374_v24 = vadd.f32 %v366_v60, %v326_v25  ;;  %v367_v30 = vmul.f32 %v1693_v7, %v1820_v36 }
 0x11e   :  { %965 = vmatpush.msrb.mxu2 %v1525_v33  ;;  %1122 = vmatmul.msk.f32.vlgmr.msra.gmra.mxu0 %vm201_vm11, %v374_v24 }
 0x120   :  { %966 = vmatpush.msrb.mxu2 %v1532_v34  ;;  %1271 = vset.pattern.permute.xlu1 %v2241_v6  ;;  %v246_v16 = vpop.permute.xlu1 %245  ;;  %v2059_v55 = vpop.permute.xlu0 %807 }
 0x121   :  { %v279_v10 = vmul.f32 %v1684_v2, %v246_v16  ;;  %311 = vperm.xlu1 %1271, %v1455_v20   ;;  %v2249_v16 = vmov 6  }
 0x122   :  { %967 = vmatpush.msrb.mxu2 %v1543_v37  ;;  %v296_v37 = vpop.permute.xlu2 %295 }
 0x123   :  { %v327_v33 = vadd.f32 %v319_v29, %v279_v10 }
 0x124   :  { %968 = vmatpush.msrb.mxu2 %v1554_v39  ;;  %v624_v23 = vpop.f32.mrf.mxu1  ;;  %v320_v39 = vmul.f32 %v1732_v54, %v296_v37 }
 0x125   :  { %648 = vxpose.xlu2.b32.start [1/8] (short) (narrow) %v624_v23, 32  ;;  %v375_v34 = vadd.f32 %v367_v30, %v327_v33  ;;  %v2250_v23 = vld [vmem:[#allocation5_spill] sm:$0xff] }
 0x126   :  { %969 = vmatpush.msrb.mxu2 %v1570_v42 }
 0x127   :  { %1123 = vmatmul.msk.f32.gmra.mxu0 %vm201_vm11, %v375_v34 }
 0x128   :  { %v251_v6 = vpop.permute.xlu1 %250  ;;  %v300_v43 = vpop.permute.xlu0 %299 }
 0x129   :  { %1272 = vset.pattern.permute.xlu1 %v2242_v13  ;;  %v280_v36 = vmul.f32 %v1720_v47, %v251_v6  ;;  %v321_v27 = vmul.f32 %v1765_v12, %v300_v43  ;;  %v283_v43 = vmul.f32 %v1837_v15, %v1912_v21 }
 0x12a   :  { %359 = vperm.xlu1 %1272, %v1455_v20   ;;  %v256_v59 = vpop.permute.xlu2 %255 }
 0x12b   :  { %v328_v63 = vadd.f32 %v320_v39, %v280_v36  ;;  %v281_v14 = vmul.f32 %v1756_v5, %v256_v59  ;;  %v827_v36 = vmul.f32 %v1684_v2, %v2020_v3 }
 0x12d   :  { %v329_v46 = vadd.f32 %v321_v27, %v281_v14 }
 0x12e   :  { %v627_v49 = vpop.f32.mrf.mxu1 }
 0x12f   :  { %649 = vxpose.xlu2.b32.cont [2/8] (short) (narrow) %v627_v49, 32 }
 0x131   :  { %v344_v40 = vpop.permute.xlu1 %343 }
 0x132   :  { %v368_v42 = vmul.f32 %v1726_v50, %v344_v40  ;;  %1274 = vset.pattern.permute.xlu1 %v1325_v61 }
 0x133   :  { %847 = vperm.xlu1 %1274, %v1445_v19  }
 0x134   :  { %v376_v35 = vadd.f32 %v368_v42, %v328_v63 }
 0x136   :  { %1124 = vmatmul.msk.f32.gmra.mxu0 %vm201_vm11, %v376_v35 }
 0x139   :  { %v348_v45 = vpop.permute.xlu1 %347 }
 0x13a   :  { %v369_v44 = vmul.f32 %v1772_v31, %v348_v45 }
 0x13b   :  { %1275 = vset.pattern.permute.xlu1 %v2239_v1 }
 0x13c   :  { %v377_v60 = vadd.f32 %v369_v44, %v329_v46  ;;  %895 = vperm.xlu1 %1275, %v1445_v19   ;;  %v282_v19 = vmul.f32 %v1792_v4, %v1871_v11  ;;  %v828_v46 = vmul.f32 %v1720_v47, %v2046_v28 }
 0x13e   :  { %1125 = vmatmul.msk.f32.gmra.mxu0 %vm201_vm11, %v377_v60 }
 0x141   :  { %v630_v25 = vpop.f32.mrf.mxu1 }
 0x142   :  { %v2075_v24 = vpop.permute.xlu1 %835  ;;  %650 = vxpose.xlu2.b32.cont [3/8] (short) (narrow) %v630_v25, 32 }
 0x144   :  { %1277 = vset.pattern.permute.xlu1 %v2242_v13 }
 0x145   :  { %363 = vperm.xlu1 %1277, %v1468_v22  }
 0x14b   :  { %v304_v38 = vpop.permute.xlu1 %303 }
 0x14c   :  { %v322_v29 = vmul.f32 %v1804_v8, %v304_v38 }
 0x14d   :  { %1278 = vset.pattern.permute.xlu1 %v2249_v16 }
 0x14e   :  { %811 = vperm.xlu1 %1278, %v1429_v17   ;;  %v330_v33 = vadd.f32 %v322_v29, %v282_v19  ;;  %v284_v29 = vmul.f32 %v1886_v51, %v1936_v62 }
 0x151   :  { %v633_v10 = vpop.f32.mrf.mxu1 }
 0x152   :  { %651 = vxpose.xlu2.b32.cont [4/8] (short) (narrow) %v633_v10, 32 }
 0x154   :  { %v352_v30 = vpop.permute.xlu1 %351 }
 0x155   :  { %v370_v34 = vmul.f32 %v2250_v23, %v352_v30 }
 0x156   :  { %1280 = vset.pattern.permute.xlu1 %v2239_v1 }
 0x157   :  { %v378_v13 = vadd.f32 %v370_v34, %v330_v33  ;;  %899 = vperm.xlu1 %1280, %v1429_v17  }
 0x159   :  { %1126 = vmatmul.msk.f32.gmra.mxu0 %vm201_vm11, %v378_v13 }
 0x15c   :  { %v636_v6 = vpop.f32.mrf.mxu1 }
 0x15d   :  { %v840_v37 = vpop.permute.xlu1 %839  ;;  %652 = vxpose.xlu2.b32.cont [5/8] (short) (narrow) %v636_v6, 32 }
 0x15e   :  { %v867_v49 = vmul.f32 %v1675_v0, %v840_v37  ;;  %v796_v37 = vpop.permute.xlu2 %795 }
 0x15f   :  { %1281 = vset.pattern.permute.xlu1 %v2249_v16 }
 0x160   :  { %v875_v11 = vadd.f32 %v867_v49, %v827_v36  ;;  %815 = vperm.xlu1 %1281, %v1440_v18  }
 0x166   :  { %v888_v39 = vpop.permute.xlu1 %887  ;;  %v884_v62 = vpop.permute.xlu2 %883 }
 0x167   :  { %v915_v40 = vmul.f32 %v1693_v7, %v888_v39  ;;  %v2251_v39 = vmov 0  }
 0x168   :  { %1282 = vset.pattern.permute.xlu1 %v2239_v1 }
 0x169   :  { %v2095_v17 = vadd.f32 %v915_v40, %v875_v11  ;;  %903 = vperm.xlu1 %1282, %v1440_v18  }
 0x16e   :  { %v639_v63 = vpop.f32.mrf.mxu1 }
 0x16f   :  { %v308_v42 = vpop.permute.xlu1 %307  ;;  %653 = vxpose.xlu2.b32.cont [6/8] (short) (narrow) %v639_v63, 32 }
 0x170   :  { %v323_v3 = vmul.f32 %v1831_v48, %v308_v42 }
 0x171   :  { %1284 = vset.pattern.permute.xlu1 %v1325_v61 }
 0x172   :  { %859 = vperm.xlu1 %1284, %v1455_v20   ;;  %v331_v59 = vadd.f32 %v323_v3, %v283_v43 }
 0x178   :  { %v356_v35 = vpop.permute.xlu1 %355 }
 0x179   :  { %v371_v27 = vmul.f32 %v1843_v58, %v356_v35  ;;  %v866_v35 = vmul.f32 %v1647_v53, %v2075_v24 }
 0x17a   :  { %1285 = vset.pattern.permute.xlu1 %v2239_v1 }
 0x17b   :  { %v379_v14 = vadd.f32 %v371_v27, %v331_v59  ;;  %907 = vperm.xlu1 %1285, %v1455_v20   ;;  %v826_v27 = vmul.f32 %v1641_v52, %v796_v37 }
 0x17d   :  { %1127 = vmatmul.msk.f32.gmra.mxu0 %vm201_vm11, %v379_v14 }
 0x180   :  { %v642_v18 = vpop.f32.mrf.mxu1 }
 0x181   :  { %v844_v45 = vpop.permute.xlu1 %843  ;;  %654 = vxpose.xlu2.b32.cont [7/8] (short) (narrow) %v642_v18, 32  ;;  %v874_v18 = vadd.f32 %v866_v35, %v826_v27 }
 0x182   :  { %v868_v44 = vmul.f32 %v1732_v54, %v844_v45  ;;  %v914_v45 = vmul.f32 %v1660_v57, %v884_v62 }
 0x183   :  { %1286 = vset.pattern.permute.xlu1 %v1325_v61 }
 0x184   :  { %v876_v21 = vadd.f32 %v868_v44, %v828_v46  ;;  %863 = vperm.xlu1 %1286, %v1468_v22   ;;  %v316_v46 = vpop.permute.xlu0 %315 }
 0x18a   :  { %v892_v60 = vpop.permute.xlu1 %891 }
 0x18b   :  { %v916_v1 = vmul.f32 %v1726_v50, %v892_v60 }
 0x18d   :  { %v924_v25 = vadd.f32 %v916_v1, %v876_v21  ;;  %v852_v21 = vpop.permute.xlu0 %851 }
 0x192   :  { %v645_v20 = vpop.f32.mrf.mxu1 }
 0x193   :  { %v312_v38 = vpop.permute.xlu1 %311  ;;  %655 = vxpose.xlu2.b32.end [8/8] (short) (narrow) %v645_v20, 32  ;;  %v829_v20 = vmul.f32 %v1756_v5, %v2059_v55 }
 0x194   :  { %v324_v16 = vmul.f32 %v1901_v32, %v312_v38 }
 0x196   :  { %v332_v10 = vadd.f32 %v324_v16, %v284_v29  ;;  %v856_v16 = vpop.permute.xlu0 %855 }
 0x19b   :  { %v423_v30 = vpop.f32.mrf.mxu0 }
 0x19c   :  { %v360_v28 = vpop.permute.xlu1 %359 }
 0x19d   :  { %v372_v19 = vmul.f32 %v1891_v26, %v360_v28 }
 0x19f   :  { %v380_v61 = vadd.f32 %v372_v19, %v332_v10 }
 0x1a1   :  { %1128 = vmatmul.msk.f32.gmra.mxu0 %vm201_vm11, %v380_v61 }
 0x1a4   :  { %v426_v33 = vpop.f32.mrf.mxu0 }
 0x1a5   :  { %v848_v36 = vpop.permute.xlu1 %847 }
 0x1a6   :  { %v869_v1 = vmul.f32 %v1765_v12, %v848_v36 }
 0x1a8   :  { %v877_v29 = vadd.f32 %v869_v1, %v829_v20 }
 0x1ae   :  { %v896_v49 = vpop.permute.xlu1 %895 }
 0x1af   :  { %v917_v38 = vmul.f32 %v1772_v31, %v896_v49 }
 0x1b1   :  { %v925_v28 = vadd.f32 %v917_v38, %v877_v29 }
 0x1b3   :  { %v429_v34 = vpop.f32.mrf.mxu0 }
 0x1b7   :  { %v2121_v40 = vpop.permute.xlu1 %363 }
 0x1b9   :  { %721 = vxpose.xlu1.b32.start [1/8] (short) (narrow) %v423_v30, 32 }
 0x1bb   :  { %v432_v13 = vpop.f32.mrf.mxu0 }
 0x1c0   :  { %v812_v3 = vpop.permute.xlu1 %811 }
 0x1c1   :  { %722 = vxpose.xlu1.b32.cont [2/8] (short) (narrow) %v426_v33, 32  ;;  %v830_v19 = vmul.f32 %v1792_v4, %v812_v3  ;;  %v820_v33 = vpop.permute.xlu0 %819 }
 0x1c9   :  { %723 = vxpose.xlu1.b32.cont [3/8] (short) (narrow) %v429_v34, 32  ;;  %v900_v14 = vpop.permute.xlu1 %899  ;;  %v824_v62 = vpop.permute.xlu0 %823 }
 0x1ca   :  { %v918_v61 = vmul.f32 %v2250_v23, %v900_v14 }
 0x1d1   :  { %724 = vxpose.xlu1.b32.cont [4/8] (short) (narrow) %v432_v13, 32  ;;  %v871_v13 = vmul.f32 %v1831_v48, %v856_v16  ;;  %v912_v27 = vpop.permute.xlu0 %911 }
 0x1d2   :  { %v816_v44 = vpop.permute.xlu1 %815 }
 0x1d3   :  { %v831_v34 = vmul.f32 %v1837_v15, %v816_v44  ;;  %v325_v44 = vmul.f32 %v1977_v41, %v316_v46 }
 0x1d5   :  { %v879_v37 = vadd.f32 %v871_v13, %v831_v34 }
 0x1d6   :  { %v435_v6 = vpop.f32.mrf.mxu0 }
 0x1d9   :  { %725 = vxpose.xlu1.b32.cont [5/8] (short) (narrow) %v435_v6, 32 }
 0x1db   :  { %v904_v24 = vpop.permute.xlu1 %903 }
 0x1dc   :  { %v919_v6 = vmul.f32 %v1843_v58, %v904_v24 }
 0x1de   :  { %v927_v36 = vadd.f32 %v919_v6, %v879_v37  ;;  %v186_v37 = vadd.f32 %v1675_v0, %v1684_v2  ;;  %v190_v2 = vadd.f32 %v1831_v48, %v1837_v15 }
 0x1e4   :  { %v860_v10 = vpop.permute.xlu1 %859 }
 0x1e5   :  { %v872_v49 = vmul.f32 %v1901_v32, %v860_v10 }
 0x1ed   :  { %v908_v55 = vpop.permute.xlu1 %907 }
 0x1f4   :  { %v2118_v11 = vpop.trf.xlu2 }
 0x1f5   :  { %1276 = vset.pattern.permute.xlu2 %v2251_v39  ;;  %v832_v39 = vmul.f32 %v1886_v51, %v820_v33 }
 0x1f7   :  { %v880_v3 = vadd.f32 %v872_v49, %v832_v39  ;;  %v187_v39 = vadd.f32 %v1732_v54, %v1720_v47 }
 0x1fa   :  { %v438_v63 = vpop.f32.mrf.mxu0 }
 0x1fb   :  { %726 = vxpose.xlu1.b32.cont [6/8] (short) (narrow) %v438_v63, 32  ;;  %v920_v63 = vmul.f32 %v1891_v26, %v908_v55 }
 0x1fc   :  { %275 = vperm.xlu2 %1276, %v1468_v22   ;;  %v665_v42 = vpop.trf.xlu2  ;;  %v922_v22 = vadd.f32 %v914_v45, %v874_v18  ;;  %v921_v18 = vmul.f32 %v1967_v9, %v912_v27 }
 0x1fd   :  { %1147 = vmatmul.msk.f32.vlgmr.msrb.gmra.mxu1 %vm201_vm11, %v665_v42  ;;  %v864_v42 = vpop.permute.xlu1 %863 }
 0x1fe   :  { %v873_v35 = vmul.f32 %v1977_v41, %v864_v42 }
 0x204   :  { %v666_v43 = vpop.trf.xlu2 }
 0x205   :  { %1148 = vmatmul.msk.f32.vlgmr.msra.gmra.mxu2 %vm201_vm11, %v666_v43  ;;  %v928_v43 = vadd.f32 %v920_v63, %v880_v3  ;;  %v195_v63 = vadd.f32 %v1726_v50, %v187_v39  ;;  %v191_v50 = vadd.f32 %v1901_v32, %v1886_v51 }
 0x207   :  { %v205_v0 = vsel %vm201_vm11, %v195_v63, 0.0 }
 0x20c   :  { %v667_v59 = vpop.trf.xlu2 }
 0x20d   :  { %1149 = vmatmul.msk.f32.gmra.mxu2 %vm201_vm11, %v667_v59  ;;  %v833_v59 = vmul.f32 %v1962_v56, %v824_v62  ;;  %v194_v62 = vadd.f32 %v1693_v7, %v186_v37 }
 0x20f   :  { %v881_v14 = vadd.f32 %v873_v35, %v833_v59  ;;  %v203_v42 = vsel %vm201_vm11, %v194_v62, 0.0 }
 0x211   :  { %v929_v45 = vadd.f32 %v921_v18, %v881_v14 }
 0x215   :  { %1162 = vmatmul.msk.f32.vlgmr.msrb.gmra.mxu2 %vm201_vm11, %v922_v22 }
 0x21d   :  { %1163 = vmatmul.msk.f32.gmra.mxu2 %vm201_vm11, %v2095_v17  ;;  %v870_v17 = vmul.f32 %v1804_v8, %v852_v21 }
 0x21e   :  { %v441_v60 = vpop.f32.mrf.mxu0 }
 0x21f   :  { %727 = vxpose.xlu1.b32.cont [7/8] (short) (narrow) %v441_v60, 32  ;;  %v878_v30 = vadd.f32 %v870_v17, %v830_v19  ;;  %v373_v60 = vmul.f32 %v1967_v9, %v2121_v40 }
 0x225   :  { %1164 = vmatmul.msk.f32.gmra.mxu2 %vm201_vm11, %v924_v25  ;;  %v926_v25 = vadd.f32 %v918_v61, %v878_v30 }
 0x22d   :  { %1165 = vmatmul.msk.f32.gmra.mxu2 %vm201_vm11, %v925_v28 }
 0x235   :  { %1166 = vmatmul.msk.f32.gmra.mxu2 %vm201_vm11, %v926_v25 }
 0x23d   :  { %1167 = vmatmul.msk.f32.gmra.mxu2 %vm201_vm11, %v927_v36  ;;  %v185_v36 = vadd.f32 %v1647_v53, %v1641_v52  ;;  %v189_v52 = vadd.f32 %v1804_v8, %v1792_v4 }
 0x23f   :  { %v193_v49 = vadd.f32 %v1660_v57, %v185_v36  ;;  %v197_v47 = vadd.f32 %v2250_v23, %v189_v52 }
 0x241   :  { %v202_v3 = vsel %vm201_vm11, %v193_v49, 0.0  ;;  %v209_v8 = vsel %vm201_vm11, %v197_v47, 0.0 }
 0x242   :  { %v204_v53 = vadd.f32 %v203_v42, %v202_v3 }
 0x244   :  { %v206_v7 = vadd.f32 %v205_v0, %v204_v53 }
 0x245   :  { %1168 = vmatmul.msk.f32.gmra.mxu2 %vm201_vm11, %v928_v43  ;;  %v188_v43 = vadd.f32 %v1765_v12, %v1756_v5  ;;  %v198_v5 = vadd.f32 %v1843_v58, %v190_v2  ;;  %v192_v12 = vadd.f32 %v1977_v41, %v1962_v56 }
 0x247   :  { %v196_v57 = vadd.f32 %v1772_v31, %v188_v43  ;;  %v199_v31 = vadd.f32 %v1891_v26, %v191_v50  ;;  %v211_v48 = vsel %vm201_vm11, %v198_v5, 0.0  ;;  %v200_v15 = vadd.f32 %v1967_v9, %v192_v12 }
 0x249   :  { %v207_v54 = vsel %vm201_vm11, %v196_v57, 0.0  ;;  %v213_v35 = vsel %vm201_vm11, %v199_v31, 0.0  ;;  %v215_v32 = vsel %vm201_vm11, %v200_v15, 0.0 }
 0x24a   :  { %v208_v4 = vadd.f32 %v207_v54, %v206_v7 }
 0x24c   :  { %v210_v23 = vadd.f32 %v209_v8, %v208_v4 }
 0x24d   :  { %1169 = vmatmul.msk.f32.gmra.mxu2 %vm201_vm11, %v929_v45 }
 0x24e   :  { %v212_v51 = vadd.f32 %v211_v48, %v210_v23 }
 0x250   :  { %v214_v59 = vadd.f32 %v213_v35, %v212_v51 }
 0x252   :  { %v216_v58 = vadd.f32 %v215_v32, %v214_v59 }
 0x254   :  { %v217_v27 = vrot.slane %v216_v58, 4 }
 0x256   :  { %v276_v22 = vpop.permute.xlu2 %275  ;;  %v218_v14 = vadd.f32 %v217_v27, %v216_v58 }
 0x257   :  { %v285_v21 = vmul.f32 %v1962_v56, %v276_v22 }
 0x258   :  { %v219_v56 = vrot.slane %v218_v14, 2 }
 0x259   :  { %v333_v24 = vadd.f32 %v325_v44, %v285_v21 }
 0x25a   :  { %v220_v41 = vadd.f32 %v219_v56, %v218_v14 }
 0x25b   :  { %v381_v1 = vadd.f32 %v373_v60, %v333_v24 }
 0x25c   :  { %v221_v18 = vrot.slane %v220_v41, 1 }
 0x25d   :  { %1129 = vmatmul.msk.f32.gmra.mxu0 %vm201_vm11, %v381_v1 }
 0x25e   :  { %v222_v45 = vadd.f32 %v221_v18, %v220_v41 }
 0x260   :  { %v223_v26 = vadd.f32 1e-14, %v222_v45 }
 0x262   :  { %1288 = vrcp.f32 %v223_v26  ;;  %vm229_vm15 = vweird.f32 %v223_v26 }
 0x265   :  { %1146 = vmatmul.msk.f32.vlgmr.msrb.gmra.mxu0 %vm201_vm11, %v2118_v11 }
 0x268   :  { %v1289_v21 = vpop.eup %1288 }
 0x269   :  { %v225_v9 = vmul.f32 %v1289_v21, %v223_v26  ;;  %vm230_vm14 = vweird.f32 %v1289_v21 }
 0x26a   :  { %vm231_vm5 = vmor %vm229_vm15, %vm230_vm14 }
 0x26b   :  { %v226_v24 = vsub.f32 1.0, %v225_v9 }
 0x26d   :  { %v227_v1 = vmul.f32 %v1289_v21, %v226_v24 }
 0x288   :  { %v2163_v20 = vpop.f32.mrf.mxu2 }
 0x290   :  { %v2165_v38 = vpop.f32.mrf.mxu2 }
 0x298   :  { %v971_v16 = vpop.f32.mrf.mxu2 }
 0x299   :  { %995 = vxpose.xlu0.b32.start [1/8] (short) (narrow) %v971_v16, 32 }
 0x2a0   :  { %v974_v29 = vpop.f32.mrf.mxu2 }
 0x2a1   :  { %996 = vxpose.xlu0.b32.cont [2/8] (short) (narrow) %v974_v29, 32  ;;  %v228_v29 = vadd.f32 %v1289_v21, %v227_v1 }
 0x2a8   :  { %v977_v46 = vpop.f32.mrf.mxu2 }
 0x2a9   :  { %997 = vxpose.xlu0.b32.cont [3/8] (short) (narrow) %v977_v46, 32  ;;  %v235_v46 = vand.u32 2147483648, %v223_v26 }
 0x2b0   :  { %v980_v28 = vpop.f32.mrf.mxu2 }
 0x2b1   :  { %998 = vxpose.xlu0.b32.cont [4/8] (short) (narrow) %v980_v28, 32  ;;  %v233_v28 = vand.u32 2147483647, %v223_v26 }
 0x2b3   :  { %vm234_vm4 = vcmp.eq.f32.partialorder %v233_v28, 8.507059e+37 }
 0x2b8   :  { %v983_v40 = vpop.f32.mrf.mxu2 }
 0x2b9   :  { %999 = vxpose.xlu0.b32.cont [5/8] (short) (narrow) %v983_v40, 32 }
 0x2c0   :  { %v986_v10 = vpop.f32.mrf.mxu2 }
 0x2c1   :  { %1000 = vxpose.xlu0.b32.cont [6/8] (short) (narrow) %v986_v10, 32 }
 0x2c8   :  { %v989_v19 = vpop.f32.mrf.mxu2 }
 0x2c9   :  { %1001 = vxpose.xlu0.b32.cont [7/8] (short) (narrow) %v989_v19, 32  ;;  %v232_v19 = vsel %vm231_vm5, %v1289_v21, %v228_v29 }
 0x2d0   :  { %v992_v17 = vpop.f32.mrf.mxu2 }
 0x2d1   :  { %1002 = vxpose.xlu0.b32.end [8/8] (short) (narrow) %v992_v17, 32  ;;  %v236_v17 = vor.u32 1.1754944e-38, %v235_v46 }
 0x2da   :  { %v444_v11 = vpop.f32.mrf.mxu0 }
 0x2db   :  { %728 = vxpose.xlu1.b32.end [8/8] (short) (narrow) %v444_v11, 32 }
 0x2e2   :  { %v709_v40 = vpop.f32.mrf.mxu0 }
 0x33d   :  { %v1011_v34 = vpop.trf.xlu0 }
 0x345   :  { %v1012_v55 = vpop.trf.xlu0 }
 0x347   :  { %v737_v61 = vpop.trf.xlu1 }
 0x348   :  { %1158 = vmatmul.msk.f32.vlgmr.msra.gmra.mxu3 %vm201_vm11, %v737_v61 }
 0x34d   :  { %v1013_v13 = vpop.trf.xlu0 }
 0x34f   :  { %v738_v30 = vpop.trf.xlu1 }
 0x350   :  { %1159 = vmatmul.msk.f32.gmra.mxu3 %vm201_vm11, %v738_v30  ;;  %v237_v30 = vsel %vm234_vm4, %v236_v17, %v232_v19 }
 0x355   :  { %v1014_v6 = vpop.trf.xlu0 }
 0x357   :  { %v739_v33 = vpop.trf.xlu1 }
 0x358   :  { %1160 = vmatmul.msk.f32.gmra.mxu3 %vm201_vm11, %v739_v33 }
 0x35f   :  { %v740_v25 = vpop.trf.xlu1 }
 0x360   :  { %1161 = vmatmul.msk.f32.gmra.mxu3 %vm201_vm11, %v740_v25  ;;  %v712_v25 = vpop.f32.mrf.mxu1 }
 0x368   :  { %1178 = vmatmul.msk.f32.vlgmr.msrb.gmra.mxu3 %vm201_vm11, %v1011_v34 }
 0x370   :  { %1179 = vmatmul.msk.f32.gmra.mxu3 %vm201_vm11, %v1012_v55 }
 0x378   :  { %1180 = vmatmul.msk.f32.gmra.mxu3 %vm201_vm11, %v1013_v13 }
 0x380   :  { %1181 = vmatmul.msk.f32.gmra.mxu3 %vm201_vm11, %v1014_v6 }
 0x3cb   :  { %v782_v22 = vpop.f32.mrf.mxu3 }
 0x3cc   :  { %v783_v10 = vadd.f32 %v782_v22, %v709_v40 }
 0x3d3   :  { %v785_v44 = vpop.f32.mrf.mxu3 }
 0x3d4   :  { %v786_v34 = vadd.f32 %v785_v44, %v712_v25 }
 0x3db   :  { %v788_v60 = vpop.f32.mrf.mxu3 }
 0x3dc   :  { %v789_v37 = vadd.f32 %v788_v60, %v2163_v20 }
 0x3e3   :  { %v791_v16 = vpop.f32.mrf.mxu3 }
 0x3e4   :  { %v792_v39 = vadd.f32 %v791_v16, %v2165_v38 }
 0x3eb   :  { %v1056_v11 = vpop.f32.mrf.mxu3 }
 0x3ec   :  { %v1068_v61 = vadd.f32 %v1056_v11, %v783_v10 }
 0x3ee   :  { %v1072_v33 = vmul.f32 %v1068_v61, %v237_v30 }
 0x3f0   :  { %1076 = vst.msk [vmem:[#allocation2] sm:$0xff] %vm201_vm11, %v1072_v33 }
 0x3f3   :  { %v1059_v55 = vpop.f32.mrf.mxu3 }
 0x3f4   :  { %v1069_v13 = vadd.f32 %v1059_v55, %v786_v34 }
 0x3f6   :  { %v1073_v6 = vmul.f32 %v1069_v13, %v237_v30 }
 0x3f8   :  { %1077 = vst.msk [vmem:[#allocation2 + $0x8] sm:$0xff] %vm201_vm11, %v1073_v6 }
 0x3fb   :  { %v1062_v36 = vpop.f32.mrf.mxu3 }
 0x3fc   :  { %v1070_v62 = vadd.f32 %v1062_v36, %v789_v37 }
 0x3fe   :  { %v1074_v49 = vmul.f32 %v1070_v62, %v237_v30 }
 0x400   :  { %1078 = vst.msk [vmem:[#allocation2 + $0x10] sm:$0xff] %vm201_vm11, %v1074_v49 }
 0x403   :  { %v1065_v63 = vpop.f32.mrf.mxu3 }
 0x404   :  { %v1071_v42 = vadd.f32 %v1065_v63, %v792_v39 }
 0x406   :  { %v1075_v3 = vmul.f32 %v1071_v42, %v237_v30 }
 0x408   :  { %1079 = vst.msk [vmem:[#allocation2 + $0x18] sm:$0xff] %vm201_vm11, %v1075_v3 }
 0x409   :  { %1092 = dma.vmem_to_hbm [thread:$0]  %s1085_s30, 512, %s1087_s6, [#allocation3], %s1328_s7, %s1328_s7, %s1329_s8  }
 0x40a   :  { %1314 = dma.done.wait [#allocation3], 512  }
 0x40b   :  { %1315 = vsyncadd [#allocation3], 4294966784 }
 0x40c   :  { %1097 = vsyncpa [#allocation3], 1 }

</bundles_post_ra>
